<compile_context>
chip_gen: v6e
topology: v6e:2x2x1
jax: 0.10.0
libtpu: 0.0.40
codegen_flags: <defaults>
</compile_context>

<pallas_src>
import functools
import numpy as np
import jax
import jax.numpy as jnp
from jax.experimental import pallas as pl
from jax.experimental.pallas import tpu as pltpu


# ---------------------------------------------------------------------------
# pe buffer construction (mirrors the PyTorch __init__, done once at build time)
# ---------------------------------------------------------------------------
def build_positional_encoding(d_model: int, max_seq_length: int = 100) -> jnp.ndarray:
    position = jnp.arange(max_seq_length, dtype=jnp.float32)[:, None]            # (L, 1)
    div_term = jnp.exp(
        jnp.arange(0, d_model, 2, dtype=jnp.float32) * (-np.log(10000.0) / d_model)
    )                                                                             # (ceil(D/2),)
    angles = position * div_term                                                  # (L, ceil(D/2))
    pe = jnp.zeros((max_seq_length, 1, d_model), dtype=jnp.float32)
    pe = pe.at[:, 0, 0::2].set(jnp.sin(angles))
    # Slice cos so odd d_model works (the PyTorch original would raise there).
    pe = pe.at[:, 0, 1::2].set(jnp.cos(angles)[:, : d_model // 2])
    return pe


# ---------------------------------------------------------------------------
# Kernels
# ---------------------------------------------------------------------------
def _add_bcast3d_kernel(x_ref, pe_ref, o_ref):
    # x: (ts, B, D), pe: (ts, 1, D) -> batch broadcast + dtype cast on the VPU.
    o_ref[...] = x_ref[...] + pe_ref[...].astype(x_ref.dtype)


def _make_lane_kernel(batch: int):
    # x: (ts, B*D), pe: (ts, D); D is a multiple of 128 so the in-kernel batch
    # broadcast is a concat of full-lane vreg copies (no HBM traffic for it).
    def kernel(x_ref, pe_ref, o_ref):
        pe = pe_ref[...].astype(x_ref.dtype)
        if batch > 1:
            pe = jnp.concatenate([pe] * batch, axis=-1)
        o_ref[...] = x_ref[...] + pe
    return kernel


# ---------------------------------------------------------------------------
# Tiling heuristics
# ---------------------------------------------------------------------------
_TARGET_TILE_BYTES = 6 << 20    # ~6 MiB of x per block (fits 2x(x+out+pe) in 48 MiB)
_VMEM_LIMIT_BYTES = 48 << 20    # explicit scoped-VMEM budget (v7x 64 MiB physical)
_MIN_PALLAS_BYTES = 64 << 10    # below this a fused XLA add is strictly faster
_MULTI_STEP_BYTES = 2 << 20     # above this, force >=2 grid steps (v7x 2 TCs)


def _sublane_multiple(itemsize: int) -> int:
    # f32 -> 8, bf16 -> 16, int8/fp8 -> 32 rows per packed (sublane, 128) tile.
    return max(8, 8 * (4 // max(1, itemsize)))


def _pick_rows(n_rows: int, vmem_row_bytes: int, itemsize: int, total_bytes: int) -> int:
    """Rows of the leading axis per block."""
    t = max(1, _TARGET_TILE_BYTES // max(1, vmem_row_bytes))
    if total_bytes > _MULTI_STEP_BYTES:
        t = min(t, (n_rows + 1) // 2)      # >= 2 grid steps so both v7x TCs help
    t = min(t, n_rows)
    if t < n_rows:
        align = _sublane_multiple(itemsize)
        if t >= align:
            t -= t % align                 # keep block boundaries on native tiles
    return max(1, t)


# ---------------------------------------------------------------------------
# Forward
# ---------------------------------------------------------------------------
def positional_encoding_forward(x: jnp.ndarray, pe: jnp.ndarray, *, use_pallas=None) -> jnp.ndarray:
    """x: (S, B, D); pe: (max_seq_length, 1, D). Returns x + pe[:S] (dtype of x)."""
    S, B, D = x.shape
    L = pe.shape[0]
    if S > L:
        raise ValueError(f"sequence length {S} exceeds max_seq_length {L}")

    pe_s = pe[:S]                                   # (S, 1, D); cast happens in-kernel
    itemsize = jnp.dtype(x.dtype).itemsize
    total_bytes = x.size * itemsize

    if use_pallas is None:
        use_pallas = total_bytes >= _MIN_PALLAS_BYTES
    if not use_pallas:
        # Tiny-input fast path: let XLA fuse the broadcast add.
        return x + pe_s.astype(x.dtype)

    cp = pltpu.CompilerParams(
        dimension_semantics=("parallel",),
        vmem_limit_bytes=_VMEM_LIMIT_BYTES,
    )

    # ---- Lane-dense path: D % 128 == 0 -> view x as (S, B*D), pe as (S, D). ----
    # Full-lane unmasked loads/stores, dense sublanes even for small B, and only
    # S*D pe elements move through HBM.
    if D % 128 == 0:
        BD = B * D
        ts = _pick_rows(S, BD * itemsize, itemsize, total_bytes)
        if ts == S or ts % 8 == 0:          # block's sublane dim must be 8-aligned or full
            x2 = x.reshape(S, BD)           # free row-major view
            pe2 = pe_s.reshape(S, D)
            out2 = pl.pallas_call(
                _make_lane_kernel(B),
                out_shape=jax.ShapeDtypeStruct((S, BD), x.dtype),
                grid=(pl.cdiv(S, ts),),
                in_specs=[
                    pl.BlockSpec((ts, BD), lambda i: (i, 0)),
                    pl.BlockSpec((ts, D), lambda i: (i, 0)),
                ],
                out_specs=pl.BlockSpec((ts, BD), lambda i: (i, 0)),
                compiler_params=cp,
            )(x2, pe2)
            return out2.reshape(S, B, D)

    # ---- General path: (ts, B, D) blocks, pe stays (ts, 1, D). ----
    # Batch broadcast happens on the VPU; tile sizing accounts for sublane/lane
    # padding so small B cannot blow the VMEM budget.
    sub = _sublane_multiple(itemsize)
    pad_b = -(-B // sub) * sub
    pad_d = -(-D // 128) * 128
    ts = _pick_rows(S, pad_b * pad_d * itemsize, itemsize, total_bytes)
    return pl.pallas_call(
        _add_bcast3d_kernel,
        out_shape=jax.ShapeDtypeStruct((S, B, D), x.dtype),
        grid=(pl.cdiv(S, ts),),
        in_specs=[
            pl.BlockSpec((ts, B, D), lambda i: (i, 0, 0)),
            pl.BlockSpec((ts, 1, D), lambda i: (i, 0, 0)),
        ],
        out_specs=pl.BlockSpec((ts, B, D), lambda i: (i, 0, 0)),
        compiler_params=cp,
    )(x, pe_s)


# ---------------------------------------------------------------------------
# Demo / correctness check
# ---------------------------------------------------------------------------
if __name__ == "__main__":
    key = jax.random.PRNGKey(0)

    # Shapes implied by the module: seq=8, batch=2, d_model=32.
    S, B, D = 8, 2, 32
    pe = build_positional_encoding(D, max_seq_length=100)
    x = jax.random.normal(key, (S, B, D), dtype=jnp.float32)
    ref = x + pe[:S]

    # 1) Default dispatch: tiny input takes the fused-XLA fast path.
    out_auto = jax.block_until_ready(positional_encoding_forward(x, pe))
    np.testing.assert_allclose(np.asarray(out_auto), np.asarray(ref), rtol=1e-6, atol=1e-6)

    # 2) Force the Pallas general path ((ts, B, D) blocks, VPU batch broadcast).
    out_gen = jax.block_until_ready(positional_encoding_forward(x, pe, use_pallas=True))
    np.testing.assert_allclose(np.asarray(out_gen), np.asarray(ref), rtol=1e-6, atol=1e-6)

    # 3) Force the lane-dense Pallas path (D % 128 == 0, in-kernel batch broadcast).
    S2, B2, D2 = 16, 2, 128
    pe2 = build_positional_encoding(D2, max_seq_length=100)
    x2 = jax.random.normal(jax.random.PRNGKey(0), (S2, B2, D2), dtype=jnp.float32)
    ref2 = x2 + pe2[:S2]
    out_lane = jax.block_until_ready(positional_encoding_forward(x2, pe2, use_pallas=True))
    np.testing.assert_allclose(np.asarray(out_lane), np.asarray(ref2), rtol=1e-6, atol=1e-6)

    print("KERNEL_OK")
</pallas_src>

<mosaic_0001>
module attributes {stable_mosaic.version = 11 : i64} {
  func.func @_add_bcast3d_kernel(%arg0: i32, %arg1: memref<8x2x32xf32, #tpu.memory_space<vmem>>, %arg2: memref<8x1x32xf32, #tpu.memory_space<vmem>>, %arg3: memref<8x2x32xf32, #tpu.memory_space<vmem>>) attributes {dimension_semantics = [#tpu.dimension_semantics<parallel>], iteration_bounds = array<i64: 1>, scalar_prefetch = 0 : i64, scratch_operands = 0 : i64, tpu.core_type = #tpu.core_type<tc>, window_params = [{transform_indices = @transform_0, window_bounds = array<i64: 8, 2, 32>}, {transform_indices = @transform_1, window_bounds = array<i64: 8, 1, 32>}, {transform_indices = @transform_2, window_bounds = array<i64: 8, 2, 32>}]} {
    %c0 = arith.constant 0 : index
    %c0_0 = arith.constant 0 : index
    %c0_1 = arith.constant 0 : index
    %0 = vector.load %arg1[%c0, %c0_0, %c0_1] : memref<8x2x32xf32, #tpu.memory_space<vmem>>, vector<8x2x32xf32>
    %c0_2 = arith.constant 0 : index
    %c0_3 = arith.constant 0 : index
    %c0_4 = arith.constant 0 : index
    %1 = vector.load %arg2[%c0_2, %c0_3, %c0_4] : memref<8x1x32xf32, #tpu.memory_space<vmem>>, vector<8x1x32xf32>
    %2 = vector.broadcast %1 : vector<8x1x32xf32> to vector<8x2x32xf32>
    %3 = arith.addf %0, %2 : vector<8x2x32xf32>
    %c0_5 = arith.constant 0 : index
    %c0_6 = arith.constant 0 : index
    %c0_7 = arith.constant 0 : index
    %4 = vector.load %arg3[%c0_5, %c0_6, %c0_7] : memref<8x2x32xf32, #tpu.memory_space<vmem>>, vector<8x2x32xf32>
    tpu.vector_store %arg3[%c0_5, %c0_6, %c0_7], %3 {strides = array<i32>} : memref<8x2x32xf32, #tpu.memory_space<vmem>>, vector<8x2x32xf32>,
    return
  }
  func.func @transform_0(%arg0: i32) -> (i32, i32, i32) {
    %c0_i32 = arith.constant 0 : i32
    %c0_i32_0 = arith.constant 0 : i32
    %c0_i32_1 = arith.constant 0 : i32
    return %arg0, %c0_i32, %c0_i32_0 : i32, i32, i32
  }
  func.func @transform_1(%arg0: i32) -> (i32, i32, i32) {
    %c0_i32 = arith.constant 0 : i32
    %c0_i32_0 = arith.constant 0 : i32
    %c0_i32_1 = arith.constant 0 : i32
    return %arg0, %c0_i32, %c0_i32_0 : i32, i32, i32
  }
  func.func @transform_2(%arg0: i32) -> (i32, i32, i32) {
    %c0_i32 = arith.constant 0 : i32
    %c0_i32_0 = arith.constant 0 : i32
    %c0_i32_1 = arith.constant 0 : i32
    return %arg0, %c0_i32, %c0_i32_0 : i32, i32, i32
  }
}

</mosaic_0001>

<bundles_post_ra>
// kernel: tpu_custom_call.1
= control target key start
LH: loop header
LB: loop body
LE: loop exit
PB: predicated region body
PF: predicated region fallthrough
CT: control target
= control target key end

     0   :  { %7 = vsyncpa [#allocation3], 0  ;;  %s268_s0 = inlined_call_operand.hbm [shape: f32[8,2,32], index: 0, kind: input, shape index: {}]   ;;  %s269_s1 = inlined_call_operand.hbm [shape: f32[8,1,32], index: 1, kind: input, shape index: {}]   ;;  %s270_s2 = inlined_call_operand.hbm [shape: f32[8,2,32], index: 2, kind: output, shape index: {}]  }
   0x1   :  { %8 = vsyncpa [#allocation6], 0 }
   0x2   :  { %9 = vsyncpa [#allocation4], 0  ;;  %s220_s9 = smov [#allocation2]  }
   0x3   :  { %s15_s10 = sshll.u32 %s220_s9, 4  ;;  %s16_s10 = int_to_ptr.vmem [resolvable:$true] %s15_s10 }
   0x4   :  { %s162_s11 = scalar_lea.vmem %s16_s10, 256  ;;  %p167_p1 = scmp.lt.s32.totalorder %s16_s10, %s16_s10 }
   0x5   :  { %p163_p0 = scmp.ne.s32.totalorder %s16_s10, %s162_s11  ;;  %p168_p2 = scmp.lt.s32.totalorder %s162_s11, %s162_s11 }
   0x7   :  { %p169_p3 = por %p168_p2, %p167_p1 }
   0x9   :  { %p170_p4 = pnand %p169_p3, %p163_p0 }
   0xb   :  { %173 = shalt.err (!%p170_p4)
}
   0xc   :  { %s221_s12 = smov 32   ;;  %s222_s13 = smov 2  }
   0xd   :  { %21 = dma.hbm_to_vmem [thread:$0]  %s268_s0, 256, %s16_s10, [#allocation3], %s221_s12, %s221_s12, %s222_s13  }
   0xe   :  { %s223_s16 = smov [#allocation5]  }
   0xf   :  { %s27_s17 = sshll.u32 %s223_s16, 4  ;;  %s28_s17 = int_to_ptr.vmem [resolvable:$true] %s27_s17 }
  0x10   :  { %s182_s18 = scalar_lea.vmem %s28_s17, 128  ;;  %p187_p6 = scmp.lt.s32.totalorder %s28_s17, %s28_s17 }
  0x11   :  { %p183_p5 = scmp.ne.s32.totalorder %s28_s17, %s182_s18  ;;  %p188_p7 = scmp.lt.s32.totalorder %s182_s18, %s182_s18 }
  0x13   :  { %p189_p8 = por %p188_p7, %p187_p6 }
  0x15   :  { %p190_p9 = pnand %p189_p8, %p183_p5 }
  0x17   :  { %193 = shalt.err (!%p190_p9)
}
  0x18   :  { %s224_s19 = smov 16   ;;  %s225_s20 = smov 1  }
  0x19   :  { %33 = dma.hbm_to_vmem [thread:$0]  %s269_s1, 128, %s28_s17, [#allocation6], %s224_s19, %s224_s19, %s225_s20  }
  0x1a   :  { %214 = dma.done.wait [#allocation3], 256  }
  0x1b   :  { %215 = vsyncadd [#allocation3], 4294967040 }
  0x1c   :  { %216 = dma.done.wait [#allocation6], 128  }
  0x1d   :  { %217 = vsyncadd [#allocation6], 4294967168  ;;  %vm112_vm0 = vcmask 254976   ;;  %s226_s0 = smov [#allocation7]   ;;  %v40_v0 = vld [vmem:[#allocation2] sm:$0x3] }
  0x1e   :  { %s251_s23 = sshll.u32 %s226_s0, 4  ;;  %v139_v1 = vld [vmem:[#allocation5] ss:$0 sm:$0xff]  ;;  %v41_v2 = vld [vmem:[#allocation2 + $0x2] sm:$0x3]  ;;  %s127_s23 = int_to_ptr.vmem [resolvable:$true] %s251_s23 }
  0x1f   :  { %v104_v3 = vadd.f32 %v139_v1, %v40_v0  ;;  %v140_v4 = vld [vmem:[#allocation5 + $0x1] ss:$0 sm:$0xff]  ;;  %v42_v5 = vld [vmem:[#allocation2 + $0x4] sm:$0x3]  ;;  %v141_v6 = vld [vmem:[#allocation5 + $0x2] ss:$0 sm:$0xff]  ;;  %p199_p11 = scmp.lt.s32.totalorder %s127_s23, %s127_s23 }
  0x20   :  { %v105_v7 = vadd.f32 %v140_v4, %v41_v2  ;;  %v106_v8 = vadd.f32 %v141_v6, %v42_v5  ;;  %v43_v9 = vld [vmem:[#allocation2 + $0x6] sm:$0x3]  ;;  %v142_v10 = vld [vmem:[#allocation5 + $0x3] ss:$0 sm:$0xff]  ;;  %v44_v11 = vld [vmem:[#allocation2 + $0x8] sm:$0x3] }
  0x21   :  { %113 = vst.msk [vmem:[#allocation7] sm:$0x3] %vm112_vm0, %v104_v3  ;;  %v107_v12 = vadd.f32 %v142_v10, %v43_v9  ;;  %v143_v13 = vld [vmem:[#allocation5 + $0x4] ss:$0 sm:$0xff]  ;;  %v45_v14 = vld [vmem:[#allocation2 + $0xa] sm:$0x3] }
  0x22   :  { %v144_v15 = vld [vmem:[#allocation5 + $0x5] ss:$0 sm:$0xff]  ;;  %114 = vst.msk [vmem:[#allocation7 + $0x2] sm:$0x3] %vm112_vm0, %v105_v7  ;;  %115 = vst.msk [vmem:[#allocation7 + $0x4] sm:$0x3] %vm112_vm0, %v106_v8  ;;  %v108_v16 = vadd.f32 %v143_v13, %v44_v11 }
  0x23   :  { %v109_v17 = vadd.f32 %v144_v15, %v45_v14  ;;  %v46_v18 = vld [vmem:[#allocation2 + $0xc] sm:$0x3]  ;;  %v145_v19 = vld [vmem:[#allocation5 + $0x6] ss:$0 sm:$0xff]  ;;  %v47_v20 = vld [vmem:[#allocation2 + $0xe] sm:$0x3] }
  0x24   :  { %116 = vst.msk [vmem:[#allocation7 + $0x6] sm:$0x3] %vm112_vm0, %v107_v12  ;;  %v110_v21 = vadd.f32 %v145_v19, %v46_v18  ;;  %v146_v22 = vld [vmem:[#allocation5 + $0x7] ss:$0 sm:$0xff]  ;;  %117 = vst.msk [vmem:[#allocation7 + $0x8] sm:$0x3] %vm112_vm0, %v108_v16 }
  0x25   :  { %118 = vst.msk [vmem:[#allocation7 + $0xa] sm:$0x3] %vm112_vm0, %v109_v17  ;;  %v111_v23 = vadd.f32 %v146_v22, %v47_v20  ;;  %s194_s1 = scalar_lea.vmem %s127_s23, 256 }
  0x26   :  { %119 = vst.msk [vmem:[#allocation7 + $0xc] sm:$0x3] %vm112_vm0, %v110_v21  ;;  %p195_p10 = scmp.ne.s32.totalorder %s127_s23, %s194_s1  ;;  %p200_p12 = scmp.lt.s32.totalorder %s194_s1, %s194_s1 }
  0x27   :  { %120 = vst.msk [vmem:[#allocation7 + $0xe] sm:$0x3] %vm112_vm0, %v111_v23 }
  0x28   :  { %p201_p13 = por %p200_p12, %p199_p11 }
  0x2a   :  { %p202_p0 = pnand %p201_p13, %p195_p10 }
  0x2c   :  { %205 = shalt.err (!%p202_p0)
}
  0x2d   :  { %132 = dma.vmem_to_hbm [thread:$0]  %s127_s23, 256, %s270_s2, [#allocation4], %s221_s12, %s221_s12, %s222_s13  }
  0x2e   :  { %218 = dma.done.wait [#allocation4], 256  }
  0x2f   :  { %219 = vsyncadd [#allocation4], 4294967040 }
  0x30   :  { %136 = vsyncpa [#allocation3], 1 }
  0x31   :  { %137 = vsyncpa [#allocation6], 1 }
  0x32   :  { %138 = vsyncpa [#allocation4], 1 }

</bundles_post_ra>
